<compile_context>
chip_gen: v5e
topology: v5e:2x2
jax: 0.10.0
libtpu: 0.0.40
codegen_flags: <defaults>
</compile_context>

<pallas_src>
import jax
import jax.numpy as jnp
import numpy as np
from jax.experimental import pallas as pl
from jax.experimental.pallas import tpu as pltpu


# ----------------------------------------------------------------------------
# helpers
# ----------------------------------------------------------------------------
_VMEM_BUDGET = 24 * 1024 * 1024   # cap on per-step tile footprint (double-buffered)
_VMEM_LIMIT = 48 * 1024 * 1024    # <= 48 MiB: leaves headroom on v7x (64 MiB physical)


def _round_up(n, m):
    return ((n + m - 1) // m) * m


def _pad_to(arr, shape):
    pads = [(0, t - s) for s, t in zip(arr.shape, shape)]
    if all(p == (0, 0) for p in pads):
        return arr
    return jnp.pad(arr, pads)


def _footprint(tm, tk, f_pad, nhid, out_lanes):
    """Rough per-step VMEM bytes (bf16 inputs, f32 out/acc, x2 double-buffering)."""
    bf, f4, dbl = 2, 4, 2
    inp = (tm * f_pad + tk * f_pad + tm * tk + f_pad * nhid) * bf
    inp += nhid * f4 + (2 * nhid) * 128 * bf + 128 * f4          # b, W_out, b_out (upper bound)
    outb = tm * out_lanes * f4
    scratch = tm * nhid * f4 + tm * 128 * f4                     # acc + rowsum (lane-padded)
    return dbl * (inp + outb) + scratch


def _choose_tiles(n_out, n_in, f_pad, nhid, out_lanes, *, tm_max=1024, tk_max=1024):
    # Prefer a single output-row tile (grid_i == 1): x @ W is then computed exactly
    # once per K slab and x is streamed from HBM exactly once.
    # (On v7x, tm_max could be set to ~m_pad//2 to shard the i axis across both TCs.)
    tm = _round_up(n_out, 16)          # 16: bf16 sublane packing
    if tm > tm_max:
        tm = tm_max
    tk = _round_up(n_in, 128)
    if tk > tk_max:
        tk = tk_max
    # Shrink the streamed reduction tile first if we would blow the VMEM budget.
    while _footprint(tm, tk, f_pad, nhid, out_lanes) > _VMEM_BUDGET and tk > 128:
        tk = max(128, tk // 2)
    while _footprint(tm, tk, f_pad, nhid, out_lanes) > _VMEM_BUDGET and tm > 16:
        tm = max(16, _round_up(tm // 2, 16))
    m_pad = _round_up(n_out, tm)
    k_pad = _round_up(n_in, tk)
    return tm, tk, m_pad, k_pad


# ----------------------------------------------------------------------------
# fused GraphSAGE layer kernel:  relu([ x[idx]@W+b  |  adj@(x@W+b) ])
# ----------------------------------------------------------------------------
def _sage_layer_kernel(xs_ref, x_ref, adj_ref, w_ref, b_ref, out_ref,
                       acc_ref, rs_ref):
    """grid = (i over out-node tiles, k over in-node tiles); k is the reduction axis.

    k == 0 : zero accumulators; write relu(x[idx] @ W + b) into out[:, :nhid]
             (the output block is resident across k).
    each k : acc += adj_{i,k} @ (x_k @ W)   (bf16 MXU, f32 accumulate)
             rs  += rowsum(adj_{i,k})        (bias hoisted out of the K loop)
    last k : out[:, nhid:] = relu(acc + rs * b)
    """
    k = pl.program_id(1)
    nhid = acc_ref.shape[-1]

    @pl.when(k == 0)
    def _init():
        acc_ref[...] = jnp.zeros_like(acc_ref)
        rs_ref[...] = jnp.zeros_like(rs_ref)
        self_feat = jnp.dot(xs_ref[...], w_ref[...],
                            preferred_element_type=jnp.float32) + b_ref[...]
        out_ref[:, :nhid] = jnp.maximum(self_feat, 0.0).astype(out_ref.dtype)

    feat = jnp.dot(x_ref[...], w_ref[...], preferred_element_type=jnp.float32)
    acc_ref[...] += jnp.dot(adj_ref[...], feat.astype(adj_ref.dtype),
                            preferred_element_type=jnp.float32)
    rs_ref[...] += jnp.sum(adj_ref[...].astype(jnp.float32), axis=-1, keepdims=True)

    @pl.when(k == pl.num_programs(1) - 1)
    def _finalize():
        agg = acc_ref[...] + rs_ref[...] * b_ref[...]
        out_ref[:, nhid:] = jnp.maximum(agg, 0.0).astype(out_ref.dtype)


# ----------------------------------------------------------------------------
# last layer fused with the classifier:
#   logits = relu(x[idx]@W+b) @ Wo[:nhid] + relu(adj@(x@W+b)) @ Wo[nhid:] + bo
# ----------------------------------------------------------------------------
def _sage_classifier_kernel(xs_ref, x_ref, adj_ref, w_ref, b_ref,
                            wo_ref, bo_ref, out_ref, acc_ref, rs_ref):
    k = pl.program_id(1)
    nhid = acc_ref.shape[-1]

    @pl.when(k == 0)
    def _init():
        acc_ref[...] = jnp.zeros_like(acc_ref)
        rs_ref[...] = jnp.zeros_like(rs_ref)
        self_feat = jnp.dot(xs_ref[...], w_ref[...],
                            preferred_element_type=jnp.float32) + b_ref[...]
        self_h = jnp.maximum(self_feat, 0.0).astype(wo_ref.dtype)
        out_ref[...] = (jnp.dot(self_h, wo_ref[:nhid, :],
                                preferred_element_type=jnp.float32)
                        + bo_ref[...]).astype(out_ref.dtype)

    feat = jnp.dot(x_ref[...], w_ref[...], preferred_element_type=jnp.float32)
    acc_ref[...] += jnp.dot(adj_ref[...], feat.astype(adj_ref.dtype),
                            preferred_element_type=jnp.float32)
    rs_ref[...] += jnp.sum(adj_ref[...].astype(jnp.float32), axis=-1, keepdims=True)

    @pl.when(k == pl.num_programs(1) - 1)
    def _finalize():
        agg_h = jnp.maximum(acc_ref[...] + rs_ref[...] * b_ref[...],
                            0.0).astype(wo_ref.dtype)
        out_ref[...] = out_ref[...] + jnp.dot(
            agg_h, wo_ref[nhid:, :], preferred_element_type=jnp.float32
        ).astype(out_ref.dtype)


# ----------------------------------------------------------------------------
# wrapper: one GraphSAGE conv layer (+ ReLU), optionally fused with gc_out
# ----------------------------------------------------------------------------
def graphsage_layer(x, adj, prev_idx, W, b, W_out=None, b_out=None,
                    *, out_dtype=jnp.bfloat16):
    n_in, f_in = x.shape
    n_out, n_in2 = adj.shape
    assert n_in2 == n_in
    f_in2, nhid = W.shape
    assert f_in2 == f_in
    assert nhid % 128 == 0, "nhid must be a multiple of 128 for lane-dense output halves"

    fuse_classifier = W_out is not None

    # bf16 MXU operands; gather the root-node rows once (self half of the concat)
    x_bf = x.astype(jnp.bfloat16)
    xs = jnp.take(x_bf, prev_idx, axis=0)

    f_pad = _round_up(f_in, 128)
    if fuse_classifier:
        nc = W_out.shape[1]
        nc_pad = _round_up(nc, 128)
        out_lanes = nc_pad
    else:
        out_lanes = 2 * nhid

    tm, tk, m_pad, k_pad = _choose_tiles(n_out, n_in, f_pad, nhid, out_lanes)

    x_p = _pad_to(x_bf, (k_pad, f_pad))
    xs_p = _pad_to(xs, (m_pad, f_pad))
    adj_p = _pad_to(adj.astype(jnp.bfloat16), (m_pad, k_pad))   # zero pad rows/cols -> exact
    w_p = _pad_to(W.astype(jnp.bfloat16), (f_pad, nhid))        # zero pad rows -> exact
    b_p = b.astype(jnp.float32).reshape(1, nhid)

    grid = (m_pad // tm, k_pad // tk)

    # NOTE: W/b/xs are resident (constant or i-only index maps); pl.Buffered(1) could
    # shave their second pipeline buffer on VMEM-tight shapes — omitted for portability.
    in_specs = [
        pl.BlockSpec((tm, f_pad), lambda i, k: (i, 0)),     # x[prev_idx] rows (resident over k)
        pl.BlockSpec((tk, f_pad), lambda i, k: (k, 0)),     # x slab (streamed over k)
        pl.BlockSpec((tm, tk), lambda i, k: (i, k)),        # adj tile (streamed)
        pl.BlockSpec((f_pad, nhid), lambda i, k: (0, 0)),   # W (resident)
        pl.BlockSpec((1, nhid), lambda i, k: (0, 0)),       # b (resident)
    ]
    args = [xs_p, x_p, adj_p, w_p, b_p]

    if fuse_classifier:
        wo_p = _pad_to(W_out.astype(jnp.bfloat16), (2 * nhid, nc_pad))
        bo_p = _pad_to(b_out.astype(jnp.float32).reshape(1, nc), (1, nc_pad))
        in_specs += [
            pl.BlockSpec((2 * nhid, nc_pad), lambda i, k: (0, 0)),   # W_out (resident)
            pl.BlockSpec((1, nc_pad), lambda i, k: (0, 0)),          # b_out (resident)
        ]
        args += [wo_p, bo_p]
        kernel = _sage_classifier_kernel
        out_shape = jax.ShapeDtypeStruct((m_pad, nc_pad), jnp.float32)
        out_spec = pl.BlockSpec((tm, nc_pad), lambda i, k: (i, 0))
    else:
        kernel = _sage_layer_kernel
        out_shape = jax.ShapeDtypeStruct((m_pad, 2 * nhid), out_dtype)
        out_spec = pl.BlockSpec((tm, 2 * nhid), lambda i, k: (i, 0))

    out = pl.pallas_call(
        kernel,
        out_shape=out_shape,
        grid_spec=pltpu.PrefetchScalarGridSpec(
            num_scalar_prefetch=0,
            grid=grid,
            in_specs=in_specs,
            out_specs=out_spec,
            scratch_shapes=[pltpu.VMEM((tm, nhid), jnp.float32),   # f32 agg accumulator
                            pltpu.VMEM((tm, 1), jnp.float32)],     # adj row-sum accumulator
        ),
        compiler_params=pltpu.CompilerParams(
            dimension_semantics=("parallel", "arbitrary"),
            vmem_limit_bytes=_VMEM_LIMIT,
        ),
    )(*args)

    if fuse_classifier:
        return out[:n_out, :nc]
    return out[:n_out]


# ----------------------------------------------------------------------------
# full forward pass (fs=False path of Graphsage_first)
# ----------------------------------------------------------------------------
def graphsage_first_forward(x, adjs, previous_indices, conv_params, out_params):
    assert len(conv_params) >= 1
    W_out, b_out = out_params
    n_layers = len(conv_params)
    h = x
    for ell, ((W, b), adj, idx) in enumerate(zip(conv_params, adjs, previous_indices)):
        if ell == n_layers - 1:
            # last GraphSAGE layer fused with the gc_out classifier
            h = graphsage_layer(h, adj, idx, W, b, W_out, b_out)
        else:
            h = graphsage_layer(h, adj, idx, W, b)
        # TODO(synk): dropout omitted (inference / eval mode identity).
    return h


# ----------------------------------------------------------------------------
# driver
# ----------------------------------------------------------------------------
if __name__ == "__main__":
    key = jax.random.PRNGKey(0)
    nfeat, nhid, num_classes, layers = 128, 128, 10, 2
    n_nodes = [256, 128, 64]  # nodes into layer 0, layer 1, and rows out of layer 1

    ks = jax.random.split(key, 16)
    x = jax.random.normal(ks[0], (n_nodes[0], nfeat), dtype=jnp.float32)

    adjs, prev_idxs = [], []
    for ell in range(layers):
        n_out, n_in = n_nodes[ell + 1], n_nodes[ell]
        a = (jax.random.uniform(ks[1 + ell], (n_out, n_in)) < 0.1).astype(jnp.float32)
        deg = jnp.maximum(a.sum(axis=1, keepdims=True), 1.0)
        adjs.append(a / deg)  # row-normalized (mean) aggregation matrix
        prev_idxs.append(
            jax.random.randint(ks[4 + ell], (n_out,), 0, n_in, dtype=jnp.int32))

    conv_params = []
    in_dim = nfeat
    for ell in range(layers):
        W = jax.random.normal(ks[7 + 2 * ell], (in_dim, nhid), dtype=jnp.float32) / jnp.sqrt(in_dim)
        b = jax.random.normal(ks[8 + 2 * ell], (nhid,), dtype=jnp.float32) * 0.1
        conv_params.append((W, b))
        in_dim = 2 * nhid
    W_out = jax.random.normal(ks[12], (2 * nhid, num_classes), dtype=jnp.float32) / jnp.sqrt(2 * nhid)
    b_out = jax.random.normal(ks[13], (num_classes,), dtype=jnp.float32) * 0.1

    out = graphsage_first_forward(x, adjs, prev_idxs, conv_params, (W_out, b_out))
    out = jax.block_until_ready(out)

    # Pure-JAX f32 reference (same math as the PyTorch module in eval mode).
    def reference(x, adjs, idxs, conv_params, out_params):
        h = x
        for (W, b), adj, idx in zip(conv_params, adjs, idxs):
            feat = h @ W + b
            h = jax.nn.relu(jnp.concatenate([feat[idx], adj @ feat], axis=1))
        W_o, b_o = out_params
        return h @ W_o + b_o

    ref = jax.block_until_ready(
        reference(x, adjs, prev_idxs, conv_params, (W_out, b_out)))

    assert out.shape == (n_nodes[-1], num_classes), out.shape
    # bf16 MXU operands -> compare against the f32 reference with bf16-appropriate tolerance
    if not np.allclose(np.asarray(out), np.asarray(ref), rtol=5e-2, atol=5e-2):
        max_err = float(np.max(np.abs(np.asarray(out) - np.asarray(ref))))
        raise AssertionError(f"mismatch vs reference, max abs err = {max_err}")

    print("KERNEL_OK")
</pallas_src>

<mosaic_0001>
module attributes {stable_mosaic.version = 11 : i64} {
  func.func @_sage_layer_kernel(%arg0: i32, %arg1: i32, %arg2: memref<128x128xbf16, #tpu.memory_space<vmem>>, %arg3: memref<256x128xbf16, #tpu.memory_space<vmem>>, %arg4: memref<128x256xbf16, #tpu.memory_space<vmem>>, %arg5: memref<128x128xbf16, #tpu.memory_space<vmem>>, %arg6: memref<1x128xf32, #tpu.memory_space<vmem>>, %arg7: memref<128x256xbf16, #tpu.memory_space<vmem>>, %arg8: memref<128x128xf32, #tpu.memory_space<vmem>>, %arg9: memref<128x1xf32, #tpu.memory_space<vmem>>) attributes {dimension_semantics = [#tpu.dimension_semantics<parallel>, #tpu.dimension_semantics<arbitrary>], iteration_bounds = array<i64: 1, 1>, scalar_prefetch = 0 : i64, scratch_operands = 2 : i64, tpu.core_type = #tpu.core_type<tc>, window_params = [{transform_indices = @transform_0, window_bounds = array<i64: 128, 128>}, {transform_indices = @transform_1, window_bounds = array<i64: 256, 128>}, {transform_indices = @transform_2, window_bounds = array<i64: 128, 256>}, {pipeline_mode = #tpu.pipeline_mode<synchronous>, transform_indices = @transform_3, window_bounds = array<i64: 128, 128>}, {pipeline_mode = #tpu.pipeline_mode<synchronous>, transform_indices = @transform_4, window_bounds = array<i64: 1, 128>}, {transform_indices = @transform_5, window_bounds = array<i64: 128, 256>}]} {
    %c0_i32 = arith.constant 0 : i32
    %0 = arith.cmpi eq, %arg1, %c0_i32 : i32
    %1 = arith.extui %0 : i1 to i32
    %c0_i32_0 = arith.constant 0 : i32
    %2 = arith.cmpi ne, %1, %c0_i32_0 : i32
    scf.if %2 {
      %cst_20 = arith.constant 0.000000e+00 : f32
      %22 = vector.broadcast %cst_20 : f32 to vector<128x128xf32>
      %c0_21 = arith.constant 0 : index
      %c0_22 = arith.constant 0 : index
      %23 = vector.load %arg8[%c0_21, %c0_22] : memref<128x128xf32, #tpu.memory_space<vmem>>, vector<128x128xf32>
      tpu.vector_store %arg8[%c0_21, %c0_22], %22 {strides = array<i32>} : memref<128x128xf32, #tpu.memory_space<vmem>>, vector<128x128xf32>,
      %cst_23 = arith.constant 0.000000e+00 : f32
      %24 = vector.broadcast %cst_23 : f32 to vector<128x1xf32>
      %c0_24 = arith.constant 0 : index
      %c0_25 = arith.constant 0 : index
      %25 = vector.load %arg9[%c0_24, %c0_25] : memref<128x1xf32, #tpu.memory_space<vmem>>, vector<128x1xf32>
      tpu.vector_store %arg9[%c0_24, %c0_25], %24 {strides = array<i32>} : memref<128x1xf32, #tpu.memory_space<vmem>>, vector<128x1xf32>,
      %c0_26 = arith.constant 0 : index
      %c0_27 = arith.constant 0 : index
      %26 = vector.load %arg2[%c0_26, %c0_27] : memref<128x128xbf16, #tpu.memory_space<vmem>>, vector<128x128xbf16>
      %c0_28 = arith.constant 0 : index
      %c0_29 = arith.constant 0 : index
      %27 = vector.load %arg5[%c0_28, %c0_29] : memref<128x128xbf16, #tpu.memory_space<vmem>>, vector<128x128xbf16>
      %cst_30 = arith.constant dense<0.000000e+00> : vector<128x128xf32>
      %28 = tpu.matmul %26, %27, %cst_30 {dimension_numbers = #tpu.dot_dimension_numbers<[1], [0], [0], [1], [0, 0, 1, 1], [], []>} : vector<128x128xbf16>, vector<128x128xbf16>, vector<128x128xf32> -> vector<128x128xf32>
      %c0_31 = arith.constant 0 : index
      %c0_32 = arith.constant 0 : index
      %29 = vector.load %arg6[%c0_31, %c0_32] : memref<1x128xf32, #tpu.memory_space<vmem>>, vector<1x128xf32>
      %30 = vector.broadcast %29 : vector<1x128xf32> to vector<128x128xf32>
      %31 = arith.addf %28, %30 : vector<128x128xf32>
      %cst_33 = arith.constant 0.000000e+00 : f32
      %32 = vector.broadcast %cst_33 : f32 to vector<128x128xf32>
      %33 = arith.maximumf %31, %32 : vector<128x128xf32>
      %34 = arith.truncf %33 : vector<128x128xf32> to vector<128x128xbf16>
      %c0_34 = arith.constant 0 : index
      %c0_35 = arith.constant 0 : index
      %35 = vector.load %arg7[%c0_34, %c0_35] : memref<128x256xbf16, #tpu.memory_space<vmem>>, vector<128x128xbf16>
      tpu.vector_store %arg7[%c0_34, %c0_35], %34 {strides = array<i32>} : memref<128x256xbf16, #tpu.memory_space<vmem>>, vector<128x128xbf16>,
    } else {
    }
    %c0 = arith.constant 0 : index
    %c0_1 = arith.constant 0 : index
    %3 = vector.load %arg3[%c0, %c0_1] : memref<256x128xbf16, #tpu.memory_space<vmem>>, vector<256x128xbf16>
    %c0_2 = arith.constant 0 : index
    %c0_3 = arith.constant 0 : index
    %4 = vector.load %arg5[%c0_2, %c0_3] : memref<128x128xbf16, #tpu.memory_space<vmem>>, vector<128x128xbf16>
    %cst = arith.constant dense<0.000000e+00> : vector<256x128xf32>
    %5 = tpu.matmul %3, %4, %cst {dimension_numbers = #tpu.dot_dimension_numbers<[1], [0], [0], [1], [0, 0, 1, 1], [], []>} : vector<256x128xbf16>, vector<128x128xbf16>, vector<256x128xf32> -> vector<256x128xf32>
    %c0_4 = arith.constant 0 : index
    %c0_5 = arith.constant 0 : index
    %6 = vector.load %arg8[%c0_4, %c0_5] : memref<128x128xf32, #tpu.memory_space<vmem>>, vector<128x128xf32>
    %c0_6 = arith.constant 0 : index
    %c0_7 = arith.constant 0 : index
    %7 = vector.load %arg4[%c0_6, %c0_7] : memref<128x256xbf16, #tpu.memory_space<vmem>>, vector<128x256xbf16>
    %8 = arith.truncf %5 : vector<256x128xf32> to vector<256x128xbf16>
    %cst_8 = arith.constant dense<0.000000e+00> : vector<128x128xf32>
    %9 = tpu.matmul %7, %8, %cst_8 {dimension_numbers = #tpu.dot_dimension_numbers<[1], [0], [0], [1], [0, 0, 1, 1], [], []>} : vector<128x256xbf16>, vector<256x128xbf16>, vector<128x128xf32> -> vector<128x128xf32>
    %10 = arith.addf %6, %9 : vector<128x128xf32>
    %c0_9 = arith.constant 0 : index
    %c0_10 = arith.constant 0 : index
    %11 = vector.load %arg8[%c0_9, %c0_10] : memref<128x128xf32, #tpu.memory_space<vmem>>, vector<128x128xf32>
    tpu.vector_store %arg8[%c0_9, %c0_10], %10 {strides = array<i32>} : memref<128x128xf32, #tpu.memory_space<vmem>>, vector<128x128xf32>,
    %c0_11 = arith.constant 0 : index
    %c0_12 = arith.constant 0 : index
    %12 = vector.load %arg9[%c0_11, %c0_12] : memref<128x1xf32, #tpu.memory_space<vmem>>, vector<128x1xf32>
    %c0_13 = arith.constant 0 : index
    %c0_14 = arith.constant 0 : index
    %13 = vector.load %arg4[%c0_13, %c0_14] : memref<128x256xbf16, #tpu.memory_space<vmem>>, vector<128x256xbf16>
    %14 = arith.extf %13 : vector<128x256xbf16> to vector<128x256xf32>
    %cst_15 = arith.constant dense<0.000000e+00> : vector<128xf32>
    %15 = vector.multi_reduction <add>, %14, %cst_15 [1] : vector<128x256xf32> to vector<128xf32>
    %16 = vector.shape_cast %15 : vector<128xf32> to vector<128x1xf32>
    %17 = arith.addf %12, %16 : vector<128x1xf32>
    %c0_16 = arith.constant 0 : index
    %c0_17 = arith.constant 0 : index
    %18 = vector.load %arg9[%c0_16, %c0_17] : memref<128x1xf32, #tpu.memory_space<vmem>>, vector<128x1xf32>
    tpu.vector_store %arg9[%c0_16, %c0_17], %17 {strides = array<i32>} : memref<128x1xf32, #tpu.memory_space<vmem>>, vector<128x1xf32>,
    %c0_i32_18 = arith.constant 0 : i32
    %19 = arith.cmpi eq, %arg1, %c0_i32_18 : i32
    %20 = arith.extui %19 : i1 to i32
    %c0_i32_19 = arith.constant 0 : i32
    %21 = arith.cmpi ne, %20, %c0_i32_19 : i32
    scf.if %21 {
      %c0_20 = arith.constant 0 : index
      %c0_21 = arith.constant 0 : index
      %22 = vector.load %arg8[%c0_20, %c0_21] : memref<128x128xf32, #tpu.memory_space<vmem>>, vector<128x128xf32>
      %c0_22 = arith.constant 0 : index
      %c0_23 = arith.constant 0 : index
      %23 = vector.load %arg9[%c0_22, %c0_23] : memref<128x1xf32, #tpu.memory_space<vmem>>, vector<128x1xf32>
      %c0_24 = arith.constant 0 : index
      %c0_25 = arith.constant 0 : index
      %24 = vector.load %arg6[%c0_24, %c0_25] : memref<1x128xf32, #tpu.memory_space<vmem>>, vector<1x128xf32>
      %25 = vector.broadcast %23 : vector<128x1xf32> to vector<128x128xf32>
      %26 = vector.broadcast %24 : vector<1x128xf32> to vector<128x128xf32>
      %27 = arith.mulf %25, %26 : vector<128x128xf32>
      %28 = arith.addf %22, %27 : vector<128x128xf32>
      %cst_26 = arith.constant 0.000000e+00 : f32
      %29 = vector.broadcast %cst_26 : f32 to vector<128x128xf32>
      %30 = arith.maximumf %28, %29 : vector<128x128xf32>
      %31 = arith.truncf %30 : vector<128x128xf32> to vector<128x128xbf16>
      %c0_27 = arith.constant 0 : index
      %c128 = arith.constant 128 : index
      %32 = vector.load %arg7[%c0_27, %c128] : memref<128x256xbf16, #tpu.memory_space<vmem>>, vector<128x128xbf16>
      tpu.vector_store %arg7[%c0_27, %c128], %31 {strides = array<i32>} : memref<128x256xbf16, #tpu.memory_space<vmem>>, vector<128x128xbf16>,
    } else {
    }
    return
  }
  func.func @transform_0(%arg0: i32, %arg1: i32) -> (i32, i32) {
    %c0_i32 = arith.constant 0 : i32
    %c0_i32_0 = arith.constant 0 : i32
    return %arg0, %c0_i32 : i32, i32
  }
  func.func @transform_1(%arg0: i32, %arg1: i32) -> (i32, i32) {
    %c0_i32 = arith.constant 0 : i32
    %c0_i32_0 = arith.constant 0 : i32
    return %arg1, %c0_i32 : i32, i32
  }
  func.func @transform_2(%arg0: i32, %arg1: i32) -> (i32, i32) {
    %c0_i32 = arith.constant 0 : i32
    return %arg0, %arg1 : i32, i32
  }
  func.func @transform_3(%arg0: i32, %arg1: i32) -> (i32, i32) {
    %c0_i32 = arith.constant 0 : i32
    %c0_i32_0 = arith.constant 0 : i32
    %c0_i32_1 = arith.constant 0 : i32
    return %c0_i32, %c0_i32_0 : i32, i32
  }
  func.func @transform_4(%arg0: i32, %arg1: i32) -> (i32, i32) {
    %c0_i32 = arith.constant 0 : i32
    %c0_i32_0 = arith.constant 0 : i32
    %c0_i32_1 = arith.constant 0 : i32
    return %c0_i32, %c0_i32_0 : i32, i32
  }
  func.func @transform_5(%arg0: i32, %arg1: i32) -> (i32, i32) {
    %c0_i32 = arith.constant 0 : i32
    %c0_i32_0 = arith.constant 0 : i32
    return %arg0, %c0_i32 : i32, i32
  }
}

</mosaic_0001>

<bundles_post_ra>
// kernel: tpu_custom_call.1
= control target key start
LH: loop header
LB: loop body
LE: loop exit
PB: predicated region body
PF: predicated region fallthrough
CT: control target
= control target key end

     0   :  { %10 = vsyncpa [#allocation5], 0  ;;  %s1916_s0 = inlined_call_operand.hbm [shape: bf16[128,128], index: 0, kind: input, shape index: {}]   ;;  %s1917_s1 = inlined_call_operand.hbm [shape: bf16[256,128], index: 1, kind: input, shape index: {}]   ;;  %s1918_s2 = inlined_call_operand.hbm [shape: bf16[128,256], index: 2, kind: input, shape index: {}]   ;;  %s1919_s3 = inlined_call_operand.hbm [shape: bf16[128,128], index: 3, kind: input, shape index: {}]   ;;  %s1920_s4 = inlined_call_operand.vmem [shape: f32[1,128], index: 4, kind: input, shape index: {}]   ;;  %s1921_s5 = inlined_call_operand.hbm [shape: bf16[128,256], index: 5, kind: output, shape index: {}]  }
   0x1   :  { %11 = vsyncpa [#allocation8], 0 }
   0x2   :  { %12 = vsyncpa [#allocation11], 0 }
   0x3   :  { %13 = vsyncpa [#allocation6], 0  ;;  %s31_s20 = sshll.u32 %s1917_s1, 4  ;;  %s1702_s21 = smov [#allocation7]   ;;  %s32_s20 = int_to_ptr.hbm [resolvable:$true] %s31_s20 }
   0x4   :  { %s33_s22 = sshll.u32 %s1702_s21, 4  ;;  %s18_s25 = sshll.u32 %s1916_s0, 4  ;;  %s34_s22 = int_to_ptr.vmem [resolvable:$true] %s33_s22  ;;  %s19_s25 = int_to_ptr.hbm [resolvable:$true] %s18_s25 }
   0x5   :  { %s1703_s26 = smov 64   ;;  %s1704_s27 = smov 4  }
   0x6   :  { %39 = dma.hbm_to_vmem [thread:$0]  %s32_s20, 2048, %s34_s22, [#allocation8], %s1703_s26, %s1703_s26, %s1704_s27  }
   0x7   :  { %s1705_s28 = smov [#allocation4]   ;;  %s44_s7 = sshll.u32 %s1918_s2, 4  ;;  %s45_s7 = int_to_ptr.hbm [resolvable:$true] %s44_s7 }
   0x8   :  { %s20_s29 = sshll.u32 %s1705_s28, 4  ;;  %s1706_s1 = smov [#allocation9]   ;;  %s21_s29 = int_to_ptr.vmem [resolvable:$true] %s20_s29 }
   0x9   :  { %26 = dma.hbm_to_vmem [thread:$0]  %s19_s25, 1024, %s21_s29, [#allocation5], %s1703_s26, %s1703_s26, %s1704_s27  }
   0xa   :  { %s46_s8 = sshll.u32 %s1706_s1, 4  ;;  %s57_s0 = sshll.u32 %s1919_s3, 4  ;;  %s47_s8 = int_to_ptr.vmem [resolvable:$true] %s46_s8  ;;  %s58_s0 = int_to_ptr.hbm [resolvable:$true] %s57_s0 }
   0xb   :  { %s1707_s11 = smov 128   ;;  %s1708_s12 = smov 8  }
   0xc   :  { %52 = dma.hbm_to_vmem [thread:$0]  %s45_s7, 2048, %s47_s8, [#allocation8], %s1707_s11, %s1707_s11, %s1708_s12  }
   0xd   :  { %s1709_s13 = smov [#allocation10]  }
   0xe   :  { %s59_s14 = sshll.u32 %s1709_s13, 4  ;;  %s60_s14 = int_to_ptr.vmem [resolvable:$true] %s59_s14 }
   0xf   :  { %65 = dma.hbm_to_vmem [thread:$0]  %s58_s0, 1024, %s60_s14, [#allocation11], %s1703_s26, %s1703_s26, %s1704_s27  }
  0x10   :  { %1694 = dma.done.wait [#allocation5], 1024  }
  0x11   :  { %1695 = vsyncadd [#allocation5], 4294966272 }
  0x12   :  { %1696 = dma.done.wait [#allocation8], 4096  }
  0x13   :  { %1697 = vsyncadd [#allocation8], 4294963200 }
  0x14   :  { %1698 = dma.done.wait [#allocation11], 1024  }
  0x15   :  { %1699 = vsyncadd [#allocation11], 4294966272  ;;  %v1493_v0 = vld [vmem:[#allocation10 + $0x38] sm:$0xff]  ;;  %v1492_v2 = vld [vmem:[#allocation10 + $0x30] sm:$0xff]  ;;  %vm104_vm0 = vcmask 7168   ;;  %s1239_s20 = sshll.u32 %s1921_s5, 4  ;;  %s1240_s20 = int_to_ptr.hbm [resolvable:$true] %s1239_s20 }
  0x16   :  { %v1517_v1 = vld [vmem:[#allocation10 + $0x38] sm:$0xff]  ;;  %253 = vmatpush.bf16.msra.mxu0 %v1493_v0  ;;  %v1516_v3 = vld [vmem:[#allocation10 + $0x30] sm:$0xff]  ;;  %1534 = vmatpush.bf16.msra.mxu2 %v1493_v0  ;;  %v1491_v4 = vld [vmem:[#allocation10 + $0x28] sm:$0xff] }
  0x17   :  { %1550 = vmatpush.bf16.msra.mxu1 %v1517_v1  ;;  %1535 = vmatpush.bf16.msra.mxu3 %v1493_v0  ;;  %v1515_v5 = vld [vmem:[#allocation10 + $0x28] sm:$0xff]  ;;  %v1490_v6 = vld [vmem:[#allocation10 + $0x20] sm:$0xff]  ;;  %v1489_v8 = vld [vmem:[#allocation10 + $0x18] sm:$0xff] }
  0x18   :  { %v1514_v7 = vld [vmem:[#allocation10 + $0x20] sm:$0xff]  ;;  %v1513_v9 = vld [vmem:[#allocation10 + $0x18] sm:$0xff]  ;;  %v1488_v10 = vld [vmem:[#allocation10 + $0x10] sm:$0xff] }
  0x19   :  { %v1512_v11 = vld [vmem:[#allocation10 + $0x10] sm:$0xff]  ;;  %v1487_v12 = vld [vmem:[#allocation10 + $0x8] sm:$0xff]  ;;  %v1486_v14 = vld [vmem:[#allocation10] sm:$0xff] }
  0x1a   :  { %254 = vmatpush.bf16.msra.mxu0 %v1492_v2  ;;  %1536 = vmatpush.bf16.msra.mxu2 %v1492_v2  ;;  %v1511_v13 = vld [vmem:[#allocation10 + $0x8] sm:$0xff]  ;;  %v1510_v15 = vld [vmem:[#allocation10] sm:$0xff]  ;;  %v1500_v17 = vld [vmem:[#allocation7 + $0x30] sm:$0xff] }
  0x1b   :  { %1551 = vmatpush.bf16.msra.mxu1 %v1516_v3  ;;  %1537 = vmatpush.bf16.msra.mxu3 %v1492_v2  ;;  %v1478_v16 = vld [vmem:[#allocation4] sm:$0xff]  ;;  %v1479_v18 = vld [vmem:[#allocation4 + $0x8] sm:$0xff]  ;;  %v1501_v19 = vld [vmem:[#allocation7 + $0x38] sm:$0xff] }
  0x1c   :  { %v1480_v20 = vld [vmem:[#allocation4 + $0x10] sm:$0xff]  ;;  %v1502_v21 = vld [vmem:[#allocation7 + $0x40] sm:$0xff]  ;;  %v1481_v22 = vld [vmem:[#allocation4 + $0x18] sm:$0xff] }
  0x1d   :  { %v1503_v23 = vld [vmem:[#allocation7 + $0x48] sm:$0xff]  ;;  %v1494_v24 = vld [vmem:[#allocation7] sm:$0xff]  ;;  %v1504_v25 = vld [vmem:[#allocation7 + $0x50] sm:$0xff] }
  0x1e   :  { %255 = vmatpush.bf16.msra.mxu0 %v1491_v4  ;;  %1538 = vmatpush.bf16.msra.mxu2 %v1491_v4  ;;  %v1495_v26 = vld [vmem:[#allocation7 + $0x8] sm:$0xff]  ;;  %v1505_v27 = vld [vmem:[#allocation7 + $0x58] sm:$0xff]  ;;  %v1496_v28 = vld [vmem:[#allocation7 + $0x10] sm:$0xff] }
  0x1f   :  { %1552 = vmatpush.bf16.msra.mxu1 %v1515_v5  ;;  %1539 = vmatpush.bf16.msra.mxu3 %v1491_v4  ;;  %v1506_v29 = vld [vmem:[#allocation7 + $0x60] sm:$0xff]  ;;  %v1497_v30 = vld [vmem:[#allocation7 + $0x18] sm:$0xff]  ;;  %v1507_v31 = vld [vmem:[#allocation7 + $0x68] sm:$0xff] }
  0x20   :  { %v1761_v32 = vld [vmem:[%s1920_s4] ss:$0 sm:$0xff]  ;;  %v1508_v34 = vld [vmem:[#allocation7 + $0x70] sm:$0xff]  ;;  %v1499_v45 = vld [vmem:[#allocation7 + $0x28] sm:$0xff] }
  0x21   :  { %v1498_v33 = vld [vmem:[#allocation7 + $0x20] sm:$0xff]  ;;  %v1509_v46 = vld [vmem:[#allocation7 + $0x78] sm:$0xff] }
  0x22   :  { %256 = vmatpush.bf16.msra.mxu0 %v1490_v6  ;;  %1540 = vmatpush.bf16.msra.mxu2 %v1490_v6  ;;  %v905_v2 = vld [vmem:[#allocation9] sm:$0xff] }
  0x23   :  { %1553 = vmatpush.bf16.msra.mxu1 %v1514_v7  ;;  %1541 = vmatpush.bf16.msra.mxu3 %v1490_v6  ;;  %v922_v6 = vunpack.c.h.bf16 %v905_v2 }
  0x26   :  { %257 = vmatpush.bf16.msra.mxu0 %v1489_v8  ;;  %1542 = vmatpush.bf16.msra.mxu2 %v1489_v8 }
  0x27   :  { %1554 = vmatpush.bf16.msra.mxu1 %v1513_v9  ;;  %1543 = vmatpush.bf16.msra.mxu3 %v1489_v8 }
  0x2a   :  { %258 = vmatpush.bf16.msra.mxu0 %v1488_v10  ;;  %1544 = vmatpush.bf16.msra.mxu2 %v1488_v10 }
  0x2b   :  { %1555 = vmatpush.bf16.msra.mxu1 %v1512_v11  ;;  %1545 = vmatpush.bf16.msra.mxu3 %v1488_v10 }
  0x2e   :  { %259 = vmatpush.bf16.msra.mxu0 %v1487_v12  ;;  %1546 = vmatpush.bf16.msra.mxu2 %v1487_v12 }
  0x2f   :  { %1556 = vmatpush.bf16.msra.mxu1 %v1511_v13  ;;  %1547 = vmatpush.bf16.msra.mxu3 %v1487_v12 }
  0x32   :  { %260 = vmatpush.bf16.msra.mxu0 %v1486_v14  ;;  %1548 = vmatpush.bf16.msra.mxu2 %v1486_v14 }
  0x33   :  { %1557 = vmatpush.bf16.msra.mxu1 %v1510_v15  ;;  %1549 = vmatpush.bf16.msra.mxu3 %v1486_v14 }
  0x35   :  { %261 = vmatmul.bf16.vlgmr.msra.gmra.mxu0 %v1478_v16 }
  0x36   :  { %542 = vmatpush.bf16.msrb.mxu0 %v1517_v1  ;;  %580 = vmatmul.bf16.vlgmr.msra.gmra.mxu1 %v1500_v17  ;;  %v907_v17 = vld [vmem:[#allocation9 + $0x10] sm:$0xff] }
  0x3a   :  { %543 = vmatpush.bf16.msrb.mxu0 %v1516_v3 }
  0x3e   :  { %544 = vmatpush.bf16.msrb.mxu0 %v1515_v5  ;;  %v921_v5 = vunpack.c.l.bf16 %v905_v2 }
  0x40   :  { %v953_v8 = vadd.f32 %v922_v6, %v921_v5 }
  0x42   :  { %545 = vmatpush.bf16.msrb.mxu0 %v1514_v7  ;;  %954 = vadd.xlane.f32.xlu0 %v953_v8  ;;  %v1484_v8 = vld [vmem:[#allocation4 + $0x30] sm:$0xff] }
  0x43   :  { %291 = vmatmul.bf16.vlgmr.msra.gmra.mxu3 %v1484_v8 }
  0x45   :  { %266 = vmatmul.bf16.gmra.mxu0 %v1479_v18 }
  0x46   :  { %546 = vmatpush.bf16.msrb.mxu0 %v1513_v9  ;;  %585 = vmatmul.bf16.gmra.mxu1 %v1501_v19 }
  0x4a   :  { %547 = vmatpush.bf16.msrb.mxu0 %v1512_v11 }
  0x4e   :  { %548 = vmatpush.bf16.msrb.mxu0 %v1511_v13 }
  0x52   :  { %549 = vmatpush.bf16.msrb.mxu0 %v1510_v15 }
  0x55   :  { %271 = vmatmul.bf16.gmra.mxu0 %v1480_v20  ;;  %v925_v20 = vunpack.c.l.bf16 %v907_v17 }
  0x56   :  { %590 = vmatmul.bf16.gmra.mxu1 %v1502_v21  ;;  %v926_v21 = vunpack.c.h.bf16 %v907_v17 }
  0x65   :  { %276 = vmatmul.bf16.gmra.mxu0 %v1481_v22 }
  0x66   :  { %595 = vmatmul.bf16.gmra.mxu1 %v1503_v23  ;;  %v959_v23 = vadd.f32 %v926_v21, %v925_v20 }
  0x68   :  { %960 = vadd.xlane.f32.xlu1 %v959_v23  ;;  %v919_v23 = vld [vmem:[#allocation9 + $0x70] sm:$0xff] }
  0x75   :  { %550 = vmatmul.bf16.vlgmr.msrb.gmra.mxu0 %v1494_v24 }
  0x76   :  { %600 = vmatmul.bf16.gmra.mxu1 %v1504_v25 }
  0x85   :  { %555 = vmatmul.bf16.gmra.mxu0 %v1495_v26 }
  0x86   :  { %605 = vmatmul.bf16.gmra.mxu1 %v1505_v27 }
  0x95   :  { %560 = vmatmul.bf16.gmra.mxu0 %v1496_v28 }
  0x96   :  { %610 = vmatmul.bf16.gmra.mxu1 %v1506_v29  ;;  %v906_v29 = vld [vmem:[#allocation9 + $0x8] sm:$0xff] }
  0xa5   :  { %565 = vmatmul.bf16.gmra.mxu0 %v1497_v30  ;;  %v909_v30 = vld [vmem:[#allocation9 + $0x20] sm:$0xff] }
  0xa6   :  { %615 = vmatmul.bf16.gmra.mxu1 %v1507_v31 }
  0xb2   :  { %v262_v35 = vpop.f32.mrf.mxu0 }
  0xb3   :  { %v581_v36 = vpop.f32.mrf.mxu1  ;;  %v263_v37 = vadd.f32 %v1761_v32, %v262_v35  ;;  %v924_v35 = vunpack.c.h.bf16 %v906_v29 }
  0xb5   :  { %v302_v38 = vmax.f32 %v263_v37, 0.0  ;;  %570 = vmatmul.bf16.gmra.mxu0 %v1498_v33  ;;  %v930_v37 = vunpack.c.h.bf16 %v909_v30 }
  0xb6   :  { %620 = vmatmul.bf16.gmra.mxu1 %v1508_v34  ;;  %v923_v34 = vunpack.c.l.bf16 %v906_v29 }
  0xb7   :  { %v318_v39 = vpack.c.bf16 %v302_v38, %v302_v38 }
  0xb8   :  { %v956_v38 = vadd.f32 %v924_v35, %v923_v34  ;;  %v950_v34 = vunpack.c.h.bf16 %v919_v23 }
  0xb9   :  { %334 = vst [vmem:[#allocation12] sm:$0xf] %v318_v39 }
  0xba   :  { %v264_v40 = vpop.f32.mrf.mxu0  ;;  %957 = vadd.xlane.f32.xlu0 %v956_v38  ;;  %v1485_v38 = vld [vmem:[#allocation4 + $0x38] sm:$0xff] }
  0xbb   :  { %v583_v41 = vpop.f32.mrf.mxu1  ;;  %v265_v42 = vadd.f32 %v1761_v32, %v264_v40  ;;  %296 = vmatmul.bf16.gmra.mxu3 %v1485_v38  ;;  %v1523_v38 = vld [vmem:[#allocation9 + $0x24] sm:$0xf0] }
  0xbc   :  { %v669_v57 = vpack.c.bf16 %v583_v41, %v581_v36  ;;  %v929_v36 = vunpack.c.l.bf16 %v909_v30  ;;  %v949_v30 = vunpack.c.l.bf16 %v919_v23 }
  0xbd   :  { %v303_v43 = vmax.f32 %v265_v42, 0.0 }
  0xbe   :  { %v965_v39 = vadd.f32 %v930_v37, %v929_v36  ;;  %v995_v36 = vadd.f32 %v950_v34, %v949_v30  ;;  %v1483_v37 = vld [vmem:[#allocation4 + $0x28] sm:$0xff] }
  0xbf   :  { %v319_v44 = vpack.c.bf16 %v303_v43, %v303_v43 }
  0xc0   :  { %966 = vadd.xlane.f32.xlu2 %v965_v39 }
  0xc1   :  { %335 = vst [vmem:[#allocation12 + $0x8] sm:$0xf] %v319_v44  ;;  %v908_v44 = vld [vmem:[#allocation9 + $0x18] sm:$0xff] }
  0xc2   :  { %v267_v47 = vpop.f32.mrf.mxu0 }
  0xc3   :  { %v586_v48 = vpop.f32.mrf.mxu1  ;;  %v268_v49 = vadd.f32 %v1761_v32, %v267_v47 }
  0xc5   :  { %v304_v50 = vmax.f32 %v268_v49, 0.0  ;;  %575 = vmatmul.bf16.gmra.mxu0 %v1499_v45  ;;  %v911_v45 = vld [vmem:[#allocation9 + $0x30] sm:$0xff]  ;;  %v928_v49 = vunpack.c.h.bf16 %v908_v44 }
  0xc6   :  { %625 = vmatmul.bf16.gmra.mxu1 %v1509_v46 }
  0xc7   :  { %v320_v51 = vpack.c.bf16 %v304_v50, %v304_v50  ;;  %v933_v50 = vunpack.c.l.bf16 %v911_v45 }
  0xc9   :  { %336 = vst [vmem:[#allocation12 + $0x10] sm:$0xf] %v320_v51  ;;  %v934_v51 = vunpack.c.h.bf16 %v911_v45  ;;  %v917_v45 = vld [vmem:[#allocation9 + $0x60] sm:$0xff] }
  0xca   :  { %v269_v52 = vpop.f32.mrf.mxu0 }
  0xcb   :  { %v588_v53 = vpop.f32.mrf.mxu1  ;;  %v270_v54 = vadd.f32 %v1761_v32, %v269_v52 }
  0xcc   :  { %v670_v55 = vpack.c.bf16 %v588_v53, %v586_v48  ;;  %v927_v48 = vunpack.c.l.bf16 %v908_v44  ;;  %v971_v53 = vadd.f32 %v934_v51, %v933_v50  ;;  %v915_v51 = vld [vmem:[#allocation9 + $0x50] sm:$0xff] }
  0xcd   :  { %v305_v56 = vmax.f32 %v270_v54, 0.0 }
  0xce   :  { %759 = vmatpush.bf16.msrb.mxu2 %v670_v55  ;;  %v962_v52 = vadd.f32 %v928_v49, %v927_v48  ;;  %972 = vadd.xlane.f32.xlu0 %v971_v53  ;;  %v945_v48 = vunpack.c.l.bf16 %v917_v45  ;;  %v946_v49 = vunpack.c.h.bf16 %v917_v45  ;;  %v942_v53 = vunpack.c.h.bf16 %v915_v51 }
  0xcf   :  { %v321_v58 = vpack.c.bf16 %v305_v56, %v305_v56  ;;  %v910_v56 = vld [vmem:[#allocation9 + $0x28] sm:$0xff] }
  0xd0   :  { %963 = vadd.xlane.f32.xlu1 %v962_v52  ;;  %v989_v50 = vadd.f32 %v946_v49, %v945_v48  ;;  %v941_v52 = vunpack.c.l.bf16 %v915_v51 }
  0xd1   :  { %337 = vst [vmem:[#allocation12 + $0x18] sm:$0xf] %v321_v58  ;;  %v932_v58 = vunpack.c.h.bf16 %v910_v56 }
  0xd2   :  { %760 = vmatpush.bf16.msrb.mxu2 %v669_v57  ;;  %v272_v59 = vpop.f32.mrf.mxu0  ;;  %v931_v57 = vunpack.c.l.bf16 %v910_v56 }
  0xd3   :  { %v1767_v60 = vpop.f32.mrf.mxu1  ;;  %v273_v61 = vadd.f32 %v1761_v32, %v272_v59 }
  0xd4   :  { %v968_v59 = vadd.f32 %v932_v58, %v931_v57  ;;  %v983_v58 = vadd.f32 %v942_v53, %v941_v52  ;;  %v1522_v53 = vld [vmem:[#allocation9 + $0x24] sm:$0xf] }
  0xd5   :  { %v306_v62 = vmax.f32 %v273_v61, 0.0 }
  0xd6   :  { %969 = vadd.xlane.f32.xlu2 %v968_v59  ;;  %v920_v59 = vld [vmem:[#allocation9 + $0x78] sm:$0xff] }
  0xd7   :  { %v322_v63 = vpack.c.bf16 %v306_v62, %v306_v62 }
  0xd9   :  { %338 = vst [vmem:[#allocation12 + $0x20] sm:$0xf] %v322_v63  ;;  %v913_v63 = vld [vmem:[#allocation9 + $0x40] sm:$0xff] }
  0xda   :  { %v274_v0 = vpop.f32.mrf.mxu0  ;;  %v938_v2 = vunpack.c.h.bf16 %v913_v63 }
  0xdb   :  { %v1770_v1 = vpop.f32.mrf.mxu1  ;;  %v275_v3 = vadd.f32 %v1761_v32, %v274_v0  ;;  %v937_v0 = vunpack.c.l.bf16 %v913_v63  ;;  %v951_v63 = vunpack.c.l.bf16 %v920_v59 }
  0xdc   :  { %v671_v4 = vpack.c.bf16 %v1770_v1, %v1767_v60 }
  0xdd   :  { %v307_v7 = vmax.f32 %v275_v3, 0.0  ;;  %v977_v3 = vadd.f32 %v938_v2, %v937_v0  ;;  %v952_v0 = vunpack.c.h.bf16 %v920_v59 }
  0xdf   :  { %v323_v9 = vpack.c.bf16 %v307_v7, %v307_v7  ;;  %978 = vadd.xlane.f32.xlu2 %v977_v3  ;;  %v1482_v7 = vld [vmem:[#allocation4 + $0x20] sm:$0xff]  ;;  %v998_v2 = vadd.f32 %v952_v0, %v951_v63  ;;  %v918_v3 = vld [vmem:[#allocation9 + $0x68] sm:$0xff] }
  0xe0   :  { %281 = vmatmul.bf16.vlgmr.msra.gmra.mxu2 %v1482_v7  ;;  %v947_v7 = vunpack.c.l.bf16 %v918_v3  ;;  %v948_v8 = vunpack.c.h.bf16 %v918_v3  ;;  %v1525_v3 = vld [vmem:[#allocation9 + $0x34] sm:$0xf0] }
  0xe1   :  { %339 = vst [vmem:[#allocation12 + $0x28] sm:$0xf] %v323_v9  ;;  %v914_v9 = vld [vmem:[#allocation9 + $0x48] sm:$0xff] }
  0xe2   :  { %v277_v10 = vpop.f32.mrf.mxu0 }
  0xe3   :  { %v1775_v11 = vpop.f32.mrf.mxu1  ;;  %v278_v12 = vadd.f32 %v1761_v32, %v277_v10  ;;  %v939_v10 = vunpack.c.l.bf16 %v914_v9 }
  0xe5   :  { %v308_v13 = vmax.f32 %v278_v12, 0.0  ;;  %v940_v12 = vunpack.c.h.bf16 %v914_v9 }
  0xe7   :  { %v324_v14 = vpack.c.bf16 %v308_v13, %v308_v13  ;;  %v916_v13 = vld [vmem:[#allocation9 + $0x58] sm:$0xff]  ;;  %v980_v17 = vadd.f32 %v940_v12, %v939_v10  ;;  %v992_v12 = vadd.f32 %v948_v8, %v947_v7 }
  0xe9   :  { %340 = vst [vmem:[#allocation12 + $0x30] sm:$0xf] %v324_v14  ;;  %v943_v14 = vunpack.c.l.bf16 %v916_v13  ;;  %981 = vadd.xlane.f32.xlu0 %v980_v17 }
  0xea   :  { %v279_v15 = vpop.f32.mrf.mxu0 }
  0xeb   :  { %v1778_v16 = vpop.f32.mrf.mxu1  ;;  %v280_v18 = vadd.f32 %v1761_v32, %v279_v15  ;;  %v944_v15 = vunpack.c.h.bf16 %v916_v13 }
  0xec   :  { %v672_v19 = vpack.c.bf16 %v1778_v16, %v1775_v11 }
  0xed   :  { %v309_v22 = vmax.f32 %v280_v18, 0.0  ;;  %v986_v18 = vadd.f32 %v944_v15, %v943_v14 }
  0xef   :  { %v325_v24 = vpack.c.bf16 %v309_v22, %v309_v22  ;;  %987 = vadd.xlane.f32.xlu2 %v986_v18  ;;  %v912_v22 = vld [vmem:[#allocation9 + $0x38] sm:$0xff]  ;;  %v1710_v18 = vmov 0.0  }
  0xf0   :  { %v936_v29 = vunpack.c.h.bf16 %v912_v22  ;;  %286 = vmatmul.bf16.gmra.mxu2 %v1483_v37  ;;  %105 = vst.msk [vmem:[#allocation3] sm:$0xff] %vm104_vm0, %v1710_v18  ;;  %v1426_v37 = vld [vmem:[#allocation9 + $0x18] sm:$0xf0] }
  0xf1   :  { %341 = vst [vmem:[#allocation12 + $0x38] sm:$0xf] %v325_v24  ;;  %v935_v24 = vunpack.c.l.bf16 %v912_v22  ;;  %990 = vadd.xlane.f32.xlu0 %v989_v50 }
  0xf2   :  { %v1783_v25 = vpop.f32.mrf.mxu0  ;;  %106 = vst.msk [vmem:[#allocation3 + $0x8] sm:$0xff] %vm104_vm0, %v1710_v18 }
  0xf3   :  { %v1785_v26 = vpop.f32.mrf.mxu1  ;;  %v974_v35 = vadd.f32 %v936_v29, %v935_v24  ;;  %107 = vst.msk [vmem:[#allocation3 + $0x10] sm:$0xff] %vm104_vm0, %v1710_v18  ;;  %v955_v24 = vpop.xlane.xlu0 %954 }
  0xf4   :  { %108 = vst.msk [vmem:[#allocation3 + $0x18] sm:$0xff] %vm104_vm0, %v1710_v18 }
  0xf5   :  { %975 = vadd.xlane.f32.xlu1 %v974_v35  ;;  %109 = vst.msk [vmem:[#allocation3 + $0x20] sm:$0xff] %vm104_vm0, %v1710_v18 }
  0xf6   :  { %110 = vst.msk [vmem:[#allocation3 + $0x28] sm:$0xff] %vm104_vm0, %v1710_v18 }
  0xf7   :  { %996 = vadd.xlane.f32.xlu2 %v995_v36  ;;  %111 = vst.msk [vmem:[#allocation3 + $0x30] sm:$0xff] %vm104_vm0, %v1710_v18  ;;  %v889_v29 = vld [vmem:[#allocation3] sm:$0xff] }
  0xf8   :  { %112 = vst.msk [vmem:[#allocation3 + $0x38] sm:$0xff] %vm104_vm0, %v1710_v18  ;;  %v1001_v35 = vadd.f32 %v955_v24, %v889_v29 }
  0xf9   :  { %999 = vadd.xlane.f32.xlu0 %v998_v2  ;;  %113 = vst.msk [vmem:[#allocation3 + $0x40] sm:$0xff] %vm104_vm0, %v1710_v18  ;;  %v1440_v2 = vld [vmem:[#allocation9 + $0x30] sm:$0xf] }
  0xfa   :  { %v1787_v27 = vpop.f32.mrf.mxu0  ;;  %114 = vst.msk [vmem:[#allocation3 + $0x48] sm:$0xff] %vm104_vm0, %v1710_v18  ;;  %v1441_v8 = vor.u32 %v1525_v3, %v1440_v2  ;;  %v1528_v2 = vld [vmem:[#allocation9 + $0x54] sm:$0xf]  ;;  %v1458_v3 = vld [vmem:[#allocation9 + $0x58] sm:$0xf0] }
  0xfb   :  { %v1789_v28 = vpop.f32.mrf.mxu1  ;;  %v663_v31 = vpack.c.bf16 %v1787_v27, %v1783_v25  ;;  %1018 = vst.msk [vmem:[#allocation3] sm:$0xff] %vm104_vm0, %v1001_v35  ;;  %v1521_v27 = vld [vmem:[#allocation9 + $0x14] sm:$0xf0]  ;;  %v1448_v35 = vld [vmem:[#allocation9 + $0x40] sm:$0xf] }
  0xfc   :  { %v673_v33 = vpack.c.bf16 %v1789_v28, %v1785_v26  ;;  %115 = vst.msk [vmem:[#allocation3 + $0x50] sm:$0xff] %vm104_vm0, %v1710_v18  ;;  %v1424_v26 = vld [vmem:[#allocation9 + $0x10] sm:$0xf]  ;;  %v892_v45 = vld [vmem:[#allocation3 + $0x18] sm:$0xff] }
  0xfd   :  { %984 = vadd.xlane.f32.xlu1 %v983_v58  ;;  %116 = vst.msk [vmem:[#allocation3 + $0x58] sm:$0xff] %vm104_vm0, %v1710_v18  ;;  %v1425_v28 = vor.u32 %v1521_v27, %v1424_v26  ;;  %v894_v58 = vld [vmem:[#allocation3 + $0x28] sm:$0xff] }
  0xfe   :  { %117 = vst.msk [vmem:[#allocation3 + $0x60] sm:$0xff] %vm104_vm0, %v1710_v18  ;;  %v895_v48 = vld [vmem:[#allocation3 + $0x30] sm:$0xff] }
  0xff   :  { %118 = vst.msk [vmem:[#allocation3 + $0x68] sm:$0xff] %vm104_vm0, %v1710_v18 }
 0x100   :  { %119 = vst.msk [vmem:[#allocation3 + $0x70] sm:$0xff] %vm104_vm0, %v1710_v18 }
 0x101   :  { %120 = vst.msk [vmem:[#allocation3 + $0x78] sm:$0xff] %vm104_vm0, %v1710_v18 }
 0x102   :  { %v1795_v40 = vpop.f32.mrf.mxu0 }
 0x103   :  { %v1797_v41 = vpop.f32.mrf.mxu1 }
 0x104   :  { %v900_v18 = vld [vmem:[#allocation3 + $0x58] sm:$0xff] }
 0x105   :  { %993 = vadd.xlane.f32.xlu1 %v992_v12 }
 0x10a   :  { %v1799_v42 = vpop.f32.mrf.mxu0 }
 0x10b   :  { %v1801_v43 = vpop.f32.mrf.mxu1  ;;  %v664_v46 = vpack.c.bf16 %v1799_v42, %v1795_v40  ;;  %v961_v40 = vpop.xlane.xlu1 %960 }
 0x10c   :  { %v674_v47 = vpack.c.bf16 %v1801_v43, %v1797_v41  ;;  %v1518_v41 = vld [vmem:[#allocation9 + $0x4] sm:$0xf]  ;;  %v1418_v43 = vld [vmem:[#allocation9 + $0x8] sm:$0xf0] }
 0x112   :  { %v1807_v54 = vpop.f32.mrf.mxu0 }
 0x113   :  { %v1809_v55 = vpop.f32.mrf.mxu1 }
 0x11a   :  { %v1811_v61 = vpop.f32.mrf.mxu0 }
 0x11b   :  { %v1813_v62 = vpop.f32.mrf.mxu1  ;;  %v665_v36 = vpack.c.bf16 %v1811_v61, %v1807_v54  ;;  %v1416_v54 = vld [vmem:[#allocation9] sm:$0xf] }
 0x122   :  { %v1815_v5 = vpop.f32.mrf.mxu0 }
 0x123   :  { %v1817_v6 = vpop.f32.mrf.mxu1 }
 0x12a   :  { %v1819_v20 = vpop.f32.mrf.mxu0 }
 0x12b   :  { %v1821_v21 = vpop.f32.mrf.mxu1  ;;  %v666_v30 = vpack.c.bf16 %v1819_v20, %v1815_v5  ;;  %v675_v5 = vpack.c.bf16 %v1813_v62, %v1809_v55  ;;  %v1053_v20 = vld [vmem:[#allocation3] sm:$0xff]  ;;  %v1519_v55 = vld [vmem:[#allocation9 + $0x4] sm:$0xf0]  ;;  %v891_v62 = vld [vmem:[#allocation3 + $0x10] sm:$0xff] }
 0x12c   :  { %v676_v34 = vpack.c.bf16 %v1821_v21, %v1817_v6  ;;  %v1711_v6 = vmov 0   ;;  %v1417_v61 = vor.u32 %v1519_v55, %v1416_v54  ;;  %v1003_v42 = vadd.f32 %v961_v40, %v891_v62  ;;  %v1520_v21 = vld [vmem:[#allocation9 + $0x14] sm:$0xf] }
 0x12d   :  { %1569 = vset.pattern.permute.xlu1 %v1711_v6  ;;  %1571 = vset.pattern.permute.xlu0 %v1711_v6  ;;  %v1429_v60 = vor.u32 %v1520_v21, %v1426_v37 }
 0x12e   :  { %1072 = vperm.xlu1 %1569, %v1053_v20   ;;  %1570 = vset.pattern.permute.xlu2 %v1711_v6  ;;  %1020 = vst.msk [vmem:[#allocation3 + $0x10] sm:$0xff] %vm104_vm0, %v1003_v42  ;;  %v896_v6 = vld [vmem:[#allocation3 + $0x38] sm:$0xff]  ;;  %v903_v20 = vld [vmem:[#allocation3 + $0x70] sm:$0xff]  ;;  %v1526_v42 = vld [vmem:[#allocation9 + $0x44] sm:$0xf] }
 0x132   :  { %v571_v39 = vpop.f32.mrf.mxu0 }
 0x133   :  { %v621_v44 = vpop.f32.mrf.mxu1  ;;  %v967_v16 = vpop.xlane.xlu2 %966 }
 0x135   :  { %v1055_v25 = vld [vmem:[#allocation3 + $0x10] sm:$0xff] }
 0x136   :  { %1082 = vperm.xlu0 %1571, %v1055_v25   ;;  %v292_v25 = vpop.f32.mrf.mxu3 }
 0x13a   :  { %v573_v56 = vpop.f32.mrf.mxu0 }
 0x13b   :  { %v623_v57 = vpop.f32.mrf.mxu1  ;;  %v667_v22 = vpack.c.bf16 %v573_v56, %v571_v39  ;;  %v1434_v56 = vld [vmem:[#allocation9 + $0x28] sm:$0xf0] }
 0x13c   :  { %v677_v23 = vpack.c.bf16 %v623_v57, %v621_v44  ;;  %v1437_v57 = vor.u32 %v1522_v53, %v1434_v56 }
 0x142   :  { %v576_v9 = vpop.f32.mrf.mxu0 }
 0x143   :  { %v626_v10 = vpop.f32.mrf.mxu1  ;;  %v964_v49 = vpop.xlane.xlu1 %963 }
 0x144   :  { %v1004_v50 = vadd.f32 %v964_v49, %v892_v45 }
 0x146   :  { %1021 = vst.msk [vmem:[#allocation3 + $0x18] sm:$0xff] %vm104_vm0, %v1004_v50 }
 0x149   :  { %v970_v59 = vpop.xlane.xlu2 %969 }
 0x14a   :  { %v578_v13 = vpop.f32.mrf.mxu0  ;;  %v1006_v63 = vadd.f32 %v970_v59, %v894_v58 }
 0x14b   :  { %v628_v14 = vpop.f32.mrf.mxu1  ;;  %v668_v15 = vpack.c.bf16 %v578_v13, %v576_v9  ;;  %v897_v9 = vld [vmem:[#allocation3 + $0x40] sm:$0xff]  ;;  %v1524_v13 = vld [vmem:[#allocation9 + $0x34] sm:$0xf] }
 0x14c   :  { %v678_v17 = vpack.c.bf16 %v628_v14, %v626_v10  ;;  %1023 = vst.msk [vmem:[#allocation3 + $0x28] sm:$0xff] %vm104_vm0, %v1006_v63  ;;  %v1442_v14 = vld [vmem:[#allocation9 + $0x38] sm:$0xf0] }
 0x14d   :  { %761 = vmatpush.bf16.msrb.mxu2 %v668_v15  ;;  %v1056_v0 = vld [vmem:[#allocation3 + $0x18] sm:$0xff]  ;;  %v1445_v15 = vor.u32 %v1524_v13, %v1442_v14 }
 0x14e   :  { %808 = vmatpush.bf16.msrb.mxu3 %v678_v17  ;;  %v898_v17 = vld [vmem:[#allocation3 + $0x48] sm:$0xff] }
 0x151   :  { %762 = vmatpush.bf16.msrb.mxu2 %v667_v22 }
 0x152   :  { %809 = vmatpush.bf16.msrb.mxu3 %v677_v23  ;;  %v979_v10 = vpop.xlane.xlu2 %978 }
 0x153   :  { %v1009_v12 = vadd.f32 %v979_v10, %v897_v9  ;;  %v1461_v10 = vor.u32 %v1528_v2, %v1458_v3 }
 0x155   :  { %763 = vmatpush.bf16.msrb.mxu2 %v666_v30  ;;  %1026 = vst.msk [vmem:[#allocation3 + $0x40] sm:$0xff] %vm104_vm0, %v1009_v12  ;;  %v1058_v30 = vld [vmem:[#allocation3 + $0x28] sm:$0xff] }
 0x156   :  { %810 = vmatpush.bf16.msrb.mxu3 %v676_v34 }
 0x159   :  { %764 = vmatpush.bf16.msrb.mxu2 %v665_v36  ;;  %v1527_v36 = vld [vmem:[#allocation9 + $0x44] sm:$0xf0] }
 0x15a   :  { %811 = vmatpush.bf16.msrb.mxu3 %v675_v5  ;;  %v1449_v5 = vor.u32 %v1527_v36, %v1448_v35 }
 0x15c   :  { %v1061_v34 = vld [vmem:[#allocation3 + $0x40] sm:$0xff] }
 0x15d   :  { %765 = vmatpush.bf16.msrb.mxu2 %v664_v46  ;;  %v1421_v46 = vor.u32 %v1518_v41, %v1418_v43  ;;  %v1450_v41 = vld [vmem:[#allocation9 + $0x48] sm:$0xf0] }
 0x15e   :  { %812 = vmatpush.bf16.msrb.mxu3 %v674_v47  ;;  %v958_v47 = vpop.xlane.xlu0 %957  ;;  %v1453_v26 = vor.u32 %v1526_v42, %v1450_v41  ;;  %v1530_v42 = vld [vmem:[#allocation9 + $0x64] sm:$0xf]  ;;  %v1466_v41 = vld [vmem:[#allocation9 + $0x68] sm:$0xf0] }
 0x161   :  { %766 = vmatpush.bf16.msrb.mxu2 %v663_v31  ;;  %v890_v31 = vld [vmem:[#allocation3 + $0x8] sm:$0xff] }
 0x162   :  { %813 = vmatpush.bf16.msrb.mxu3 %v673_v33  ;;  %v893_v33 = vld [vmem:[#allocation3 + $0x20] sm:$0xff]  ;;  %v1002_v11 = vadd.f32 %v958_v47, %v890_v31  ;;  %v988_v24 = vpop.xlane.xlu2 %987 }
 0x163   :  { %v1012_v29 = vadd.f32 %v988_v24, %v900_v18  ;;  %v901_v31 = vld [vmem:[#allocation3 + $0x60] sm:$0xff] }
 0x164   :  { %767 = vmatmul.bf16.vlgmr.msrb.gmra.mxu2 %v1417_v61  ;;  %1019 = vst.msk [vmem:[#allocation3 + $0x8] sm:$0xff] %vm104_vm0, %v1002_v11 }
 0x165   :  { %1029 = vst.msk [vmem:[#allocation3 + $0x58] sm:$0xff] %vm104_vm0, %v1012_v29 }
 0x166   :  { %814 = vmatpush.bf16.msrb.mxu3 %v672_v19  ;;  %v1005_v19 = vadd.f32 %v967_v16, %v893_v33  ;;  %v973_v51 = vpop.xlane.xlu0 %972 }
 0x167   :  { %v1007_v52 = vadd.f32 %v973_v51, %v895_v48  ;;  %v904_v51 = vld [vmem:[#allocation3 + $0x78] sm:$0xff] }
 0x168   :  { %1022 = vst.msk [vmem:[#allocation3 + $0x20] sm:$0xff] %vm104_vm0, %v1005_v19  ;;  %v976_v54 = vpop.xlane.xlu1 %975 }
 0x169   :  { %1024 = vst.msk [vmem:[#allocation3 + $0x30] sm:$0xff] %vm104_vm0, %v1007_v52  ;;  %v1008_v55 = vadd.f32 %v976_v54, %v896_v6 }
 0x16a   :  { %815 = vmatpush.bf16.msrb.mxu3 %v671_v4  ;;  %v1432_v4 = vld [vmem:[#allocation9 + $0x20] sm:$0xf]  ;;  %v997_v61 = vpop.xlane.xlu2 %996 }
 0x16b   :  { %v1054_v1 = vld [vmem:[#allocation3 + $0x8] sm:$0xff]  ;;  %v1433_v44 = vor.u32 %v1523_v38, %v1432_v4  ;;  %v1015_v62 = vadd.f32 %v997_v61, %v903_v20  ;;  %1025 = vst.msk [vmem:[#allocation3 + $0x38] sm:$0xff] %vm104_vm0, %v1008_v55  ;;  %v899_v38 = vld [vmem:[#allocation3 + $0x50] sm:$0xff] }
 0x16c   :  { %1077 = vperm.xlu2 %1570, %v1054_v1   ;;  %v1064_v43 = vld [vmem:[#allocation3 + $0x58] sm:$0xff] }
 0x16d   :  { %816 = vmatmul.bf16.vlgmr.msrb.gmra.mxu3 %v1421_v46  ;;  %1032 = vst.msk [vmem:[#allocation3 + $0x70] sm:$0xff] %vm104_vm0, %v1015_v62  ;;  %v282_v46 = vpop.f32.mrf.mxu2  ;;  %v1529_v1 = vld [vmem:[#allocation9 + $0x54] sm:$0xf0] }
 0x16e   :  { %v982_v22 = vpop.xlane.xlu0 %981  ;;  %v283_v27 = vadd.f32 %v1761_v32, %v282_v46  ;;  %v1472_v46 = vld [vmem:[#allocation9 + $0x70] sm:$0xf] }
 0x16f   :  { %v1057_v39 = vld [vmem:[#allocation3 + $0x20] sm:$0xff]  ;;  %v1010_v23 = vadd.f32 %v982_v22, %v898_v17 }
 0x170   :  { %1092 = vperm.xlu1 %1569, %v1057_v39   ;;  %v1059_v7 = vld [vmem:[#allocation3 + $0x30] sm:$0xff]  ;;  %v310_v33 = vmax.f32 %v283_v27, 0.0  ;;  %v985_v50 = vpop.xlane.xlu1 %984 }
 0x171   :  { %1027 = vst.msk [vmem:[#allocation3 + $0x48] sm:$0xff] %vm104_vm0, %v1010_v23  ;;  %v1011_v52 = vadd.f32 %v985_v50, %v899_v38  ;;  %v1532_v27 = vld [vmem:[#allocation9 + $0x74] sm:$0xf] }
 0x172   :  { %v326_v19 = vpack.c.bf16 %v310_v33, %v310_v33  ;;  %v1060_v37 = vld [vmem:[#allocation3 + $0x38] sm:$0xff]  ;;  %v1892_v33 = vld [vmem:[%s1920_s4] ss:$0 sm:$0xff]  ;;  %s1712_s4 = smov [#allocation12]  }
 0x173   :  { %1028 = vst.msk [vmem:[#allocation3 + $0x50] sm:$0xff] %vm104_vm0, %v1011_v52  ;;  %s1237_s17 = sshll.u32 %s1712_s4, 4  ;;  %s1238_s17 = int_to_ptr.vmem [resolvable:$true] %s1237_s17 }
 0x174   :  { %772 = vmatmul.bf16.gmra.mxu2 %v1425_v28  ;;  %1087 = vperm.xlu2 %1570, %v1056_v0   ;;  %v293_v28 = vadd.f32 %v1761_v32, %v292_v25  ;;  %v1067_v4 = vld [vmem:[#allocation3 + $0x70] sm:$0xff]  ;;  %342 = vst [vmem:[#allocation12 + $0x40] sm:$0xf] %v326_v19  ;;  %v1533_v25 = vld [vmem:[#allocation9 + $0x74] sm:$0xf0] }
 0x175   :  { %v284_v39 = vpop.f32.mrf.mxu2 }
 0x176   :  { %v314_v47 = vmax.f32 %v293_v28, 0.0  ;;  %v991_v11 = vpop.xlane.xlu0 %990  ;;  %v285_v48 = vadd.f32 %v1761_v32, %v284_v39  ;;  %v1474_v28 = vld [vmem:[#allocation9 + $0x78] sm:$0xf0] }
 0x177   :  { %v1013_v16 = vadd.f32 %v991_v11, %v901_v31 }
 0x178   :  { %1102 = vperm.xlu1 %1569, %v1059_v7   ;;  %v1062_v40 = vld [vmem:[#allocation3 + $0x48] sm:$0xff]  ;;  %v330_v21 = vpack.c.bf16 %v314_v47, %v314_v47  ;;  %v311_v53 = vmax.f32 %v285_v48, 0.0  ;;  %v994_v14 = vpop.xlane.xlu1 %993 }
 0x179   :  { %1117 = vperm.xlu0 %1571, %v1062_v40   ;;  %1030 = vst.msk [vmem:[#allocation3 + $0x60] sm:$0xff] %vm104_vm0, %v1013_v16  ;;  %v902_v7 = vld [vmem:[#allocation3 + $0x68] sm:$0xff] }
 0x17a   :  { %346 = vst [vmem:[#allocation12 + $0x60] sm:$0xf] %v330_v21  ;;  %v327_v59 = vpack.c.bf16 %v311_v53, %v311_v53  ;;  %v1063_v29 = vld [vmem:[#allocation3 + $0x50] sm:$0xff] }
 0x17c   :  { %1097 = vperm.xlu2 %1570, %v1058_v30   ;;  %343 = vst [vmem:[#allocation12 + $0x48] sm:$0xf] %v327_v59  ;;  %v1464_v30 = vld [vmem:[#allocation9 + $0x60] sm:$0xf] }
 0x17d   :  { %821 = vmatmul.bf16.gmra.mxu3 %v1429_v60  ;;  %v1456_v60 = vld [vmem:[#allocation9 + $0x50] sm:$0xf] }
 0x17e   :  { %v1457_v45 = vor.u32 %v1529_v1, %v1456_v60 }
 0x180   :  { %1112 = vperm.xlu1 %1569, %v1061_v34   ;;  %v1065_v0 = vld [vmem:[#allocation3 + $0x60] sm:$0xff]  ;;  %v1531_v34 = vld [vmem:[#allocation9 + $0x64] sm:$0xf0] }
 0x181   :  { %1132 = vperm.xlu0 %1571, %v1065_v0  }
 0x184   :  { %777 = vmatmul.bf16.gmra.mxu2 %v1433_v44  ;;  %1107 = vperm.xlu2 %1570, %v1060_v37   ;;  %v294_v44 = vpop.f32.mrf.mxu3 }
 0x185   :  { %v295_v49 = vadd.f32 %v1761_v32, %v294_v44 }
 0x187   :  { %v315_v56 = vmax.f32 %v295_v49, 0.0 }
 0x188   :  { %1127 = vperm.xlu1 %1569, %v1064_v43   ;;  %v1469_v43 = vor.u32 %v1530_v42, %v1466_v41 }
 0x189   :  { %v331_v63 = vpack.c.bf16 %v315_v56, %v315_v56 }
 0x18b   :  { %347 = vst [vmem:[#allocation12 + $0x68] sm:$0xf] %v331_v63 }
 0x18c   :  { %v297_v9 = vpop.f32.mrf.mxu3  ;;  %1122 = vperm.xlu2 %1570, %v1063_v29  }
 0x18d   :  { %826 = vmatmul.bf16.gmra.mxu3 %v1437_v57  ;;  %v1000_v57 = vpop.xlane.xlu0 %999  ;;  %v298_v13 = vadd.f32 %v1761_v32, %v297_v9 }
 0x18e   :  { %v1016_v58 = vadd.f32 %v1000_v57, %v904_v51 }
 0x18f   :  { %v316_v18 = vmax.f32 %v298_v13, 0.0 }
 0x190   :  { %1142 = vperm.xlu1 %1569, %v1067_v4   ;;  %1033 = vst.msk [vmem:[#allocation3 + $0x78] sm:$0xff] %vm104_vm0, %v1016_v58 }
 0x191   :  { %v332_v23 = vpack.c.bf16 %v316_v18, %v316_v18 }
 0x193   :  { %348 = vst [vmem:[#allocation12 + $0x70] sm:$0xf] %v332_v23 }
 0x194   :  { %782 = vmatmul.bf16.gmra.mxu2 %v1441_v8  ;;  %v287_v8 = vpop.f32.mrf.mxu2  ;;  %v299_v36 = vpop.f32.mrf.mxu3 }
 0x195   :  { %v288_v12 = vadd.f32 %v1761_v32, %v287_v8  ;;  %v300_v20 = vadd.f32 %v1761_v32, %v299_v36 }
 0x197   :  { %v312_v17 = vmax.f32 %v288_v12, 0.0  ;;  %v1068_v24 = vld [vmem:[#allocation3 + $0x78] sm:$0xff]  ;;  %v317_v55 = vmax.f32 %v300_v20, 0.0 }
 0x198   :  { %1147 = vperm.xlu0 %1571, %v1068_v24  }
 0x199   :  { %v328_v22 = vpack.c.bf16 %v312_v17, %v312_v17  ;;  %v333_v40 = vpack.c.bf16 %v317_v55, %v317_v55 }
 0x19b   :  { %344 = vst [vmem:[#allocation12 + $0x50] sm:$0xf] %v328_v22 }
 0x19c   :  { %v289_v35 = vpop.f32.mrf.mxu2  ;;  %349 = vst [vmem:[#allocation12 + $0x78] sm:$0xf] %v333_v40 }
 0x19d   :  { %831 = vmatmul.bf16.gmra.mxu3 %v1445_v15  ;;  %v1014_v15 = vadd.f32 %v994_v14, %v902_v7  ;;  %v290_v6 = vadd.f32 %v1761_v32, %v289_v35  ;;  %v1477_v32 = vor.u32 %v1532_v27, %v1474_v28 }
 0x19f   :  { %1031 = vst.msk [vmem:[#allocation3 + $0x68] sm:$0xff] %vm104_vm0, %v1014_v15  ;;  %v313_v54 = vmax.f32 %v290_v6, 0.0 }
 0x1a0   :  { %v1073_v47 = vpop.permute.xlu1 %1072 }
 0x1a1   :  { %v329_v62 = vpack.c.bf16 %v313_v54, %v313_v54  ;;  %v1153_v11 = vmul.f32 %v1892_v33, %v1073_v47 }
 0x1a3   :  { %345 = vst [vmem:[#allocation12 + $0x58] sm:$0xf] %v329_v62 }
 0x1a4   :  { %787 = vmatmul.bf16.gmra.mxu2 %v1449_v5  ;;  %v1465_v5 = vor.u32 %v1531_v34, %v1464_v30 }
 0x1a6   :  { %v1066_v61 = vld [vmem:[#allocation3 + $0x68] sm:$0xff] }
 0x1a7   :  { %1137 = vperm.xlu2 %1570, %v1066_v61  }
 0x1a8   :  { %v1083_v49 = vpop.permute.xlu0 %1082 }
 0x1a9   :  { %v1155_v52 = vmul.f32 %v1892_v33, %v1083_v49 }
 0x1ad   :  { %836 = vmatmul.bf16.gmra.mxu3 %v1453_v26  ;;  %v1473_v26 = vor.u32 %v1533_v25, %v1472_v46 }
 0x1b4   :  { %792 = vmatmul.bf16.gmra.mxu2 %v1457_v45 }
 0x1bd   :  { %841 = vmatmul.bf16.gmra.mxu3 %v1461_v10 }
 0x1c4   :  { %797 = vmatmul.bf16.gmra.mxu2 %v1465_v5 }
 0x1c6   :  { %v1078_v60 = vpop.permute.xlu2 %1077 }
 0x1c7   :  { %v1154_v38 = vmul.f32 %v1892_v33, %v1078_v60 }
 0x1cd   :  { %846 = vmatmul.bf16.gmra.mxu3 %v1469_v43 }
 0x1ce   :  { %v1088_v59 = vpop.permute.xlu2 %1087 }
 0x1cf   :  { %v1156_v2 = vmul.f32 %v1892_v33, %v1088_v59 }
 0x1d4   :  { %802 = vmatmul.bf16.gmra.mxu2 %v1473_v26 }
 0x1d6   :  { %v1098_v23 = vpop.permute.xlu2 %1097 }
 0x1d7   :  { %v1158_v30 = vmul.f32 %v1892_v33, %v1098_v23 }
 0x1dd   :  { %851 = vmatmul.bf16.gmra.mxu3 %v1477_v32 }
 0x1de   :  { %v1108_v41 = vpop.permute.xlu2 %1107 }
 0x1df   :  { %v1160_v25 = vmul.f32 %v1892_v33, %v1108_v41 }
 0x1e2   :  { %v1093_v10 = vpop.permute.xlu1 %1092 }
 0x1e3   :  { %v1157_v14 = vmul.f32 %v1892_v33, %v1093_v10 }
 0x1e7   :  { %v768_v31 = vpop.f32.mrf.mxu2 }
 0x1ea   :  { %v1103_v6 = vpop.permute.xlu1 %1102 }
 0x1eb   :  { %v1159_v55 = vmul.f32 %v1892_v33, %v1103_v6 }
 0x1ef   :  { %v770_v19 = vpop.f32.mrf.mxu2 }
 0x1f0   :  { %v817_v16 = vpop.f32.mrf.mxu3 }
 0x1f1   :  { %v818_v21 = vadd.f32 %v817_v16, %v768_v31 }
 0x1f2   :  { %v1113_v31 = vpop.permute.xlu1 %1112 }
 0x1f3   :  { %v1169_v37 = vadd.f32 %v1153_v11, %v818_v21  ;;  %v1161_v16 = vmul.f32 %v1892_v33, %v1113_v31 }
 0x1f5   :  { %v1185_v1 = vmax.f32 %v1169_v37, 0.0 }
 0x1f7   :  { %v1201_v4 = vpack.c.bf16 %v1185_v1, %v1185_v1  ;;  %v773_v44 = vpop.f32.mrf.mxu2  ;;  %v1118_v1 = vpop.permute.xlu0 %1117 }
 0x1f8   :  { %v819_v39 = vpop.f32.mrf.mxu3 }
 0x1f9   :  { %1217 = vst [vmem:[#allocation12 + $0x4] sm:$0xf] %v1201_v4  ;;  %v820_v45 = vadd.f32 %v819_v39, %v770_v19  ;;  %v1162_v39 = vmul.f32 %v1892_v33, %v1118_v1 }
 0x1fb   :  { %v1170_v48 = vadd.f32 %v1154_v38, %v820_v45 }
 0x1fd   :  { %v1186_v50 = vmax.f32 %v1170_v48, 0.0 }
 0x1ff   :  { %v1202_v51 = vpack.c.bf16 %v1186_v50, %v1186_v50  ;;  %v775_v56 = vpop.f32.mrf.mxu2 }
 0x200   :  { %v822_v53 = vpop.f32.mrf.mxu3 }
 0x201   :  { %1218 = vst [vmem:[#allocation12 + $0xc] sm:$0xf] %v1202_v51  ;;  %v823_v57 = vadd.f32 %v822_v53, %v773_v44  ;;  %v1123_v51 = vpop.permute.xlu2 %1122 }
 0x202   :  { %v1163_v53 = vmul.f32 %v1892_v33, %v1123_v51 }
 0x203   :  { %v1171_v58 = vadd.f32 %v1155_v52, %v823_v57 }
 0x205   :  { %v1187_v63 = vmax.f32 %v1171_v58, 0.0 }
 0x207   :  { %v1203_v0 = vpack.c.bf16 %v1187_v63, %v1187_v63  ;;  %v778_v7 = vpop.f32.mrf.mxu2 }
 0x208   :  { %v824_v3 = vpop.f32.mrf.mxu3 }
 0x209   :  { %1219 = vst [vmem:[#allocation12 + $0x14] sm:$0xf] %v1203_v0  ;;  %v825_v8 = vadd.f32 %v824_v3, %v775_v56 }
 0x20b   :  { %v1172_v9 = vadd.f32 %v1156_v2, %v825_v8  ;;  %v1128_v2 = vpop.permute.xlu1 %1127 }
 0x20d   :  { %v1188_v12 = vmax.f32 %v1172_v9, 0.0 }
 0x20f   :  { %v1204_v13 = vpack.c.bf16 %v1188_v12, %v1188_v12  ;;  %v780_v17 = vpop.f32.mrf.mxu2 }
 0x210   :  { %v827_v15 = vpop.f32.mrf.mxu3 }
 0x211   :  { %1220 = vst [vmem:[#allocation12 + $0x1c] sm:$0xf] %v1204_v13  ;;  %v828_v18 = vadd.f32 %v827_v15, %v778_v7  ;;  %v1164_v7 = vmul.f32 %v1892_v33, %v1128_v2  ;;  %v1133_v13 = vpop.permute.xlu0 %1132 }
 0x212   :  { %v1165_v15 = vmul.f32 %v1892_v33, %v1133_v13 }
 0x213   :  { %v1173_v22 = vadd.f32 %v1157_v14, %v828_v18 }
 0x215   :  { %v1189_v24 = vmax.f32 %v1173_v22, 0.0 }
 0x217   :  { %v1205_v29 = vpack.c.bf16 %v1189_v24, %v1189_v24  ;;  %v783_v35 = vpop.f32.mrf.mxu2 }
 0x218   :  { %v829_v34 = vpop.f32.mrf.mxu3 }
 0x219   :  { %1221 = vst [vmem:[#allocation12 + $0x24] sm:$0xf] %v1205_v29  ;;  %v830_v36 = vadd.f32 %v829_v34, %v780_v17  ;;  %v1138_v29 = vpop.permute.xlu2 %1137 }
 0x21b   :  { %v1174_v5 = vadd.f32 %v1158_v30, %v830_v36 }
 0x21d   :  { %v1190_v20 = vmax.f32 %v1174_v5, 0.0 }
 0x21f   :  { %v1206_v54 = vpack.c.bf16 %v1190_v20, %v1190_v20  ;;  %v785_v62 = vpop.f32.mrf.mxu2  ;;  %v1143_v20 = vpop.permute.xlu1 %1142 }
 0x220   :  { %v832_v61 = vpop.f32.mrf.mxu3 }
 0x221   :  { %1222 = vst [vmem:[#allocation12 + $0x2c] sm:$0xf] %v1206_v54  ;;  %v833_v40 = vadd.f32 %v832_v61, %v783_v35  ;;  %v1166_v35 = vmul.f32 %v1892_v33, %v1138_v29 }
 0x223   :  { %v1175_v42 = vadd.f32 %v1159_v55, %v833_v40 }
 0x225   :  { %v1191_v43 = vmax.f32 %v1175_v42, 0.0 }
 0x227   :  { %v1207_v46 = vpack.c.bf16 %v1191_v43, %v1191_v43  ;;  %v788_v27 = vpop.f32.mrf.mxu2  ;;  %v1148_v43 = vpop.permute.xlu0 %1147 }
 0x228   :  { %v834_v26 = vpop.f32.mrf.mxu3 }
 0x229   :  { %1223 = vst [vmem:[#allocation12 + $0x34] sm:$0xf] %v1207_v46  ;;  %v835_v28 = vadd.f32 %v834_v26, %v785_v62  ;;  %v1167_v62 = vmul.f32 %v1892_v33, %v1143_v20 }
 0x22b   :  { %v1176_v32 = vadd.f32 %v1160_v25, %v835_v28 }
 0x22d   :  { %v1192_v47 = vmax.f32 %v1176_v32, 0.0 }
 0x22f   :  { %v1208_v11 = vpack.c.bf16 %v1192_v47, %v1192_v47  ;;  %v790_v21 = vpop.f32.mrf.mxu2 }
 0x230   :  { %v837_v19 = vpop.f32.mrf.mxu3 }
 0x231   :  { %1224 = vst [vmem:[#allocation12 + $0x3c] sm:$0xf] %v1208_v11  ;;  %v838_v37 = vadd.f32 %v837_v19, %v788_v27  ;;  %v1168_v27 = vmul.f32 %v1892_v33, %v1148_v43 }
 0x233   :  { %v1177_v60 = vadd.f32 %v1161_v16, %v838_v37 }
 0x235   :  { %v1193_v4 = vmax.f32 %v1177_v60, 0.0 }
 0x237   :  { %v1209_v38 = vpack.c.bf16 %v1193_v4, %v1193_v4  ;;  %v793_v45 = vpop.f32.mrf.mxu2 }
 0x238   :  { %v839_v44 = vpop.f32.mrf.mxu3 }
 0x239   :  { %1225 = vst [vmem:[#allocation12 + $0x44] sm:$0xf] %v1209_v38  ;;  %v840_v48 = vadd.f32 %v839_v44, %v790_v21 }
 0x23b   :  { %v1178_v49 = vadd.f32 %v1162_v39, %v840_v48 }
 0x23d   :  { %v1194_v50 = vmax.f32 %v1178_v49, 0.0 }
 0x23f   :  { %v1210_v52 = vpack.c.bf16 %v1194_v50, %v1194_v50  ;;  %v795_v57 = vpop.f32.mrf.mxu2 }
 0x240   :  { %v842_v56 = vpop.f32.mrf.mxu3 }
 0x241   :  { %1226 = vst [vmem:[#allocation12 + $0x4c] sm:$0xf] %v1210_v52  ;;  %v843_v58 = vadd.f32 %v842_v56, %v793_v45 }
 0x243   :  { %v1179_v59 = vadd.f32 %v1163_v53, %v843_v58 }
 0x245   :  { %v1195_v63 = vmax.f32 %v1179_v59, 0.0 }
 0x247   :  { %v1211_v0 = vpack.c.bf16 %v1195_v63, %v1195_v63  ;;  %v798_v9 = vpop.f32.mrf.mxu2 }
 0x248   :  { %v844_v3 = vpop.f32.mrf.mxu3 }
 0x249   :  { %1227 = vst [vmem:[#allocation12 + $0x54] sm:$0xf] %v1211_v0  ;;  %v845_v8 = vadd.f32 %v844_v3, %v795_v57 }
 0x24b   :  { %v1180_v10 = vadd.f32 %v1164_v7, %v845_v8 }
 0x24d   :  { %v1196_v12 = vmax.f32 %v1180_v10, 0.0 }
 0x24f   :  { %v1212_v14 = vpack.c.bf16 %v1196_v12, %v1196_v12  ;;  %v800_v23 = vpop.f32.mrf.mxu2 }
 0x250   :  { %v847_v17 = vpop.f32.mrf.mxu3 }
 0x251   :  { %1228 = vst [vmem:[#allocation12 + $0x5c] sm:$0xf] %v1212_v14  ;;  %v848_v18 = vadd.f32 %v847_v17, %v798_v9 }
 0x253   :  { %v1181_v22 = vadd.f32 %v1165_v15, %v848_v18 }
 0x255   :  { %v1197_v24 = vmax.f32 %v1181_v22, 0.0 }
 0x257   :  { %v1213_v30 = vpack.c.bf16 %v1197_v24, %v1197_v24  ;;  %v803_v54 = vpop.f32.mrf.mxu2 }
 0x258   :  { %v849_v34 = vpop.f32.mrf.mxu3 }
 0x259   :  { %1229 = vst [vmem:[#allocation12 + $0x64] sm:$0xf] %v1213_v30  ;;  %v850_v36 = vadd.f32 %v849_v34, %v800_v23 }
 0x25b   :  { %v1182_v5 = vadd.f32 %v1166_v35, %v850_v36 }
 0x25d   :  { %v1198_v6 = vmax.f32 %v1182_v5, 0.0 }
 0x25f   :  { %v1214_v55 = vpack.c.bf16 %v1198_v6, %v1198_v6  ;;  %v805_v25 = vpop.f32.mrf.mxu2 }
 0x260   :  { %v852_v61 = vpop.f32.mrf.mxu3 }
 0x261   :  { %1230 = vst [vmem:[#allocation12 + $0x6c] sm:$0xf] %v1214_v55  ;;  %v853_v40 = vadd.f32 %v852_v61, %v803_v54 }
 0x263   :  { %v1183_v42 = vadd.f32 %v1167_v62, %v853_v40 }
 0x265   :  { %v1199_v41 = vmax.f32 %v1183_v42, 0.0 }
 0x267   :  { %v1215_v46 = vpack.c.bf16 %v1199_v41, %v1199_v41 }
 0x268   :  { %v854_v26 = vpop.f32.mrf.mxu3 }
 0x269   :  { %1231 = vst [vmem:[#allocation12 + $0x74] sm:$0xf] %v1215_v46  ;;  %v855_v28 = vadd.f32 %v854_v26, %v805_v25 }
 0x26b   :  { %v1184_v32 = vadd.f32 %v1168_v27, %v855_v28 }
 0x26d   :  { %v1200_v31 = vmax.f32 %v1184_v32, 0.0 }
 0x26f   :  { %v1216_v47 = vpack.c.bf16 %v1200_v31, %v1200_v31 }
 0x271   :  { %1232 = vst [vmem:[#allocation12 + $0x7c] sm:$0xf] %v1216_v47 }
 0x272   :  { %1245 = dma.vmem_to_hbm [thread:$0]  %s1238_s17, 2048, %s1240_s20, [#allocation6], %s1707_s11, %s1707_s11, %s1708_s12  }
 0x273   :  { %1700 = dma.done.wait [#allocation6], 2048  }
 0x274   :  { %1701 = vsyncadd [#allocation6], 4294965248 }
 0x275   :  { %1250 = vsyncpa [#allocation5], 1 }
 0x276   :  { %1251 = vsyncpa [#allocation8], 1 }
 0x277   :  { %1252 = vsyncpa [#allocation11], 1 }
 0x278   :  { %1253 = vsyncpa [#allocation6], 1 }

</bundles_post_ra>
